<compile_context>
chip_gen: v5e
topology: v5e:2x2
jax: 0.10.0
libtpu: 0.0.40
codegen_flags: <defaults>
</compile_context>

<pallas_src>
import math

import jax
import jax.numpy as jnp
import numpy as np
from jax import lax
from jax.experimental import pallas as pl
from jax.experimental.pallas import tpu as pltpu


def _round_up(x, k):
    return ((x + k - 1) // k) * k


def densify_kernel(rows_ref, cols_ref, vals_ref, a_ref):
    """COO -> dense row-tile of A, accumulated over nnz chunks.

    rows/cols (1, CHUNK) int32, vals (1, CHUNK) f32  (lane-major);
    a_ref (TM, n_pad) f32, resident across the nnz-chunk grid axis.
    """
    k = pl.program_id(1)                          # nnz-chunk (reduction) axis

    @pl.when(k == 0)
    def _():
        a_ref[...] = jnp.zeros_like(a_ref)

    tm, n_pad = a_ref.shape
    chunk = rows_ref.shape[1]
    row_base = pl.program_id(0) * tm

    rows = rows_ref[...]                          # (1, chunk) int32
    cols = cols_ref[...]                          # (1, chunk) int32
    vals = vals_ref[...]                          # (1, chunk) f32

    # Rv[r, kk] = vals[kk] if rows[kk] == row_base + r else 0   (f32, exact)
    row_iota = lax.broadcasted_iota(jnp.int32, (tm, chunk), 0) + row_base
    r_scaled = jnp.where(row_iota == rows, vals, 0.0)           # (tm, chunk)

    # Ct[c, kk] = 1 if cols[kk] == c  (built transposed so cols stays lane-major)
    col_iota = lax.broadcasted_iota(jnp.int32, (n_pad, chunk), 0)
    ct = (col_iota == cols).astype(jnp.float32)                 # (n_pad, chunk)

    # A_tile += Rv @ Ct^T : contract over the chunk (lane) axis on both sides.
    a_ref[...] += lax.dot_general(
        r_scaled, ct,
        dimension_numbers=(((1,), (1,)), ((), ())),
        preferred_element_type=jnp.float32)


def dense_matmul_kernel(a_ref, w_ref, b_ref, o_ref):
    """o = A_tile @ W_tile + bias_tile.  All operands in VMEM."""
    o_ref[...] = (jnp.dot(a_ref[...], w_ref[...],
                          preferred_element_type=jnp.float32)
                  + b_ref[...]).astype(o_ref.dtype)


def make_sparse_linear(weight, bias=None, *, tn=256, tm=256, nnz_chunk=512):
    """Returns apply(indices, values, m, n) == spmm(indices, values, m, n, W) + bias.

    The padded weight / bias live outside the hot path (built once here).
    """
    weight = jnp.asarray(weight, jnp.float32)
    in_features, out_features = weight.shape

    n_pad = max(_round_up(in_features, 128), 128)

    # Pick the out_features tile: 256 by default, 128 when out is small so the
    # grid still has >= 2 blocks for v7x's two TensorCores.
    tn = max(128, _round_up(tn, 128))
    n_out_128 = max(_round_up(out_features, 128), 128)
    tn = min(tn, n_out_128)
    if n_out_128 // tn < 2 and n_out_128 >= 256:
        tn = 128
    n_out_pad = _round_up(n_out_128, tn)

    # Pad W / bias ONCE (lane-dense); skip the copy when already aligned.
    if weight.shape == (n_pad, n_out_pad):
        w_p = weight
    else:
        w_p = jnp.zeros((n_pad, n_out_pad), jnp.float32).at[
            :in_features, :out_features].set(weight)
    b_p = jnp.zeros((1, n_out_pad), jnp.float32)
    if bias is not None:
        b_p = b_p.at[0, :out_features].set(jnp.asarray(bias, jnp.float32))

    tm = max(8, (tm // 8) * 8)
    nnz_chunk = max(128, _round_up(nnz_chunk, 128))

    def apply(indices, values, m, n):
        assert n == in_features, "n must equal in_features"
        nnz = int(values.shape[0])

        tm_eff = min(tm, max(_round_up(m, 8), 8))
        m_pad = max(_round_up(m, tm_eff), tm_eff)
        chunk = min(nnz_chunk, max(_round_up(nnz, 128), 128))
        nnz_pad = max(_round_up(nnz, chunk), chunk)

        rows = jnp.asarray(indices[0], jnp.int32)
        cols = jnp.asarray(indices[1], jnp.int32)
        vals = jnp.asarray(values, jnp.float32)

        # Lane-major packing; padded entries have vals == 0 -> contribute 0.
        rows2d = jnp.zeros((1, nnz_pad), jnp.int32).at[0, :nnz].set(rows)
        cols2d = jnp.zeros((1, nnz_pad), jnp.int32).at[0, :nnz].set(cols)
        vals2d = jnp.zeros((1, nnz_pad), jnp.float32).at[0, :nnz].set(vals)

        # ---- Phase 1: densify A once (nnz chunked, innermost reduction axis).
        a_dense = pl.pallas_call(
            densify_kernel,
            out_shape=jax.ShapeDtypeStruct((m_pad, n_pad), jnp.float32),
            grid_spec=pltpu.PrefetchScalarGridSpec(
                num_scalar_prefetch=0,
                grid=(m_pad // tm_eff, nnz_pad // chunk),
                in_specs=[
                    pl.BlockSpec((1, chunk), lambda i, k: (0, k)),   # rows
                    pl.BlockSpec((1, chunk), lambda i, k: (0, k)),   # cols
                    pl.BlockSpec((1, chunk), lambda i, k: (0, k)),   # vals
                ],
                out_specs=pl.BlockSpec((tm_eff, n_pad), lambda i, k: (i, 0)),
            ),
            compiler_params=pltpu.CompilerParams(
                dimension_semantics=("parallel", "arbitrary"),
            ),
            cost_estimate=pl.CostEstimate(
                flops=2 * m_pad * nnz_pad * n_pad,
                transcendentals=0,
                bytes_accessed=4 * (3 * nnz_pad + m_pad * n_pad)),
        )(rows2d, cols2d, vals2d)

        # ---- Phase 2: dense MXU matmul, tiled over (m, out_features).
        grid = (m_pad // tm_eff, n_out_pad // tn)
        vmem_need = 4 * (2 * tm_eff * n_pad      # double-buffered A tile
                         + 2 * n_pad * tn        # double-buffered W tile
                         + 2 * tn                # bias tile
                         + 2 * tm_eff * tn)      # output tile
        vmem_limit = int(min(max(2 * vmem_need, 32 * 2**20), 48 * 2**20))

        out_padded = pl.pallas_call(
            dense_matmul_kernel,
            out_shape=jax.ShapeDtypeStruct((m_pad, n_out_pad), jnp.float32),
            grid_spec=pltpu.PrefetchScalarGridSpec(
                num_scalar_prefetch=0,
                grid=grid,
                in_specs=[
                    pl.BlockSpec((tm_eff, n_pad), lambda i, j: (i, 0)),  # A
                    pl.BlockSpec((n_pad, tn), lambda i, j: (0, j)),      # W
                    pl.BlockSpec((1, tn), lambda i, j: (0, j)),          # bias
                ],
                out_specs=pl.BlockSpec((tm_eff, tn), lambda i, j: (i, j)),
            ),
            compiler_params=pltpu.CompilerParams(
                dimension_semantics=("parallel", "parallel"),
                vmem_limit_bytes=vmem_limit,
            ),
            cost_estimate=pl.CostEstimate(
                flops=2 * m_pad * n_pad * n_out_pad,
                transcendentals=0,
                bytes_accessed=4 * (m_pad * n_pad + n_pad * n_out_pad
                                    + n_out_pad + m_pad * n_out_pad)),
        )(a_dense, w_p, b_p)

        return out_padded[:m, :out_features]

    return apply


def sparse_linear_pallas(indices, values, m, n, weight, bias=None, **kw):
    """One-shot convenience wrapper (prefer make_sparse_linear in a hot loop)."""
    return make_sparse_linear(weight, bias, **kw)(indices, values, m, n)


if __name__ == "__main__":
    def run_case(m, in_features, out_features, nnz, key):
        k_w, k_b, k_r, k_c, k_v = jax.random.split(key, 5)

        # Mimic reset_parameters(): kaiming_uniform_(a=sqrt(5)) on an
        # (in_features, out_features) tensor -> U(-1/sqrt(out_features), ...);
        # bias ~ U(-1/sqrt(fan_in), 1/sqrt(fan_in)) with the same fan_in.
        w_bound = 1.0 / math.sqrt(out_features)
        weight = jax.random.uniform(
            k_w, (in_features, out_features), jnp.float32, -w_bound, w_bound)
        bias = jax.random.uniform(
            k_b, (out_features,), jnp.float32, -w_bound, w_bound)

        rows = jax.random.randint(k_r, (nnz,), 0, m, dtype=jnp.int32)
        cols = jax.random.randint(k_c, (nnz,), 0, in_features, dtype=jnp.int32)
        indices = jnp.stack([rows, cols], axis=0)            # [2, nnz]
        values = jax.random.normal(k_v, (nnz,), jnp.float32)

        layer = make_sparse_linear(weight, bias)
        out = layer(indices, values, m, in_features)
        out = jax.block_until_ready(out)

        # Independent numpy reference: densify (duplicates sum) + matmul + bias.
        dense = np.zeros((m, in_features), np.float64)
        np.add.at(dense, (np.asarray(rows), np.asarray(cols)),
                  np.asarray(values, np.float64))
        ref = dense @ np.asarray(weight, np.float64) + np.asarray(bias, np.float64)[None, :]
        np.testing.assert_allclose(np.asarray(out), ref.astype(np.float32),
                                   rtol=2e-3, atol=2e-3)

    key = jax.random.PRNGKey(0)
    k1, k2 = jax.random.split(key)
    # Small case from the module's forward (single 128-lane output tile).
    run_case(m=8, in_features=32, out_features=16, nnz=24, key=k1)
    # Exercises a 2-tile out_features grid (tn drops to 128) and padded m / n.
    run_case(m=10, in_features=48, out_features=192, nnz=40, key=k2)

    print("KERNEL_OK")
</pallas_src>

<mosaic_0001>
module attributes {stable_mosaic.version = 11 : i64} {
  func.func @densify_kernel(%arg0: i32, %arg1: i32, %arg2: memref<1x128xi32, #tpu.memory_space<vmem>>, %arg3: memref<1x128xi32, #tpu.memory_space<vmem>>, %arg4: memref<1x128xf32, #tpu.memory_space<vmem>>, %arg5: memref<8x128xf32, #tpu.memory_space<vmem>>) attributes {dimension_semantics = [#tpu.dimension_semantics<parallel>, #tpu.dimension_semantics<arbitrary>], iteration_bounds = array<i64: 1, 1>, scalar_prefetch = 0 : i64, scratch_operands = 0 : i64, tpu.core_type = #tpu.core_type<tc>, window_params = [{transform_indices = @transform_0, window_bounds = array<i64: 1, 128>}, {transform_indices = @transform_1, window_bounds = array<i64: 1, 128>}, {transform_indices = @transform_2, window_bounds = array<i64: 1, 128>}, {transform_indices = @transform_3, window_bounds = array<i64: 8, 128>}]} {
    %c0_i32 = arith.constant 0 : i32
    %0 = arith.cmpi eq, %arg1, %c0_i32 : i32
    %1 = arith.extui %0 : i1 to i32
    %c0_i32_0 = arith.constant 0 : i32
    %2 = arith.cmpi ne, %1, %c0_i32_0 : i32
    scf.if %2 {
      %cst_11 = arith.constant 0.000000e+00 : f32
      %25 = vector.broadcast %cst_11 : f32 to vector<8x128xf32>
      %c0_12 = arith.constant 0 : index
      %c0_13 = arith.constant 0 : index
      %26 = vector.load %arg5[%c0_12, %c0_13] : memref<8x128xf32, #tpu.memory_space<vmem>>, vector<8x128xf32>
      tpu.vector_store %arg5[%c0_12, %c0_13], %25 {strides = array<i32>} : memref<8x128xf32, #tpu.memory_space<vmem>>, vector<8x128xf32>,
    } else {
    }
    %c8_i32 = arith.constant 8 : i32
    %3 = arith.muli %arg0, %c8_i32 : i32
    %c0 = arith.constant 0 : index
    %c0_1 = arith.constant 0 : index
    %4 = vector.load %arg2[%c0, %c0_1] : memref<1x128xi32, #tpu.memory_space<vmem>>, vector<1x128xi32>
    %c0_2 = arith.constant 0 : index
    %c0_3 = arith.constant 0 : index
    %5 = vector.load %arg3[%c0_2, %c0_3] : memref<1x128xi32, #tpu.memory_space<vmem>>, vector<1x128xi32>
    %c0_4 = arith.constant 0 : index
    %c0_5 = arith.constant 0 : index
    %6 = vector.load %arg4[%c0_4, %c0_5] : memref<1x128xf32, #tpu.memory_space<vmem>>, vector<1x128xf32>
    %7 = tpu.iota {dimensions = array<i32: 0>} : vector<8x128xi32>
    %8 = vector.broadcast %3 : i32 to vector<8x128xi32>
    %9 = arith.addi %7, %8 : vector<8x128xi32>
    %10 = vector.broadcast %4 : vector<1x128xi32> to vector<8x128xi32>
    %11 = arith.cmpi eq, %9, %10 : vector<8x128xi32>
    %cst = arith.constant 0.000000e+00 : f32
    %12 = vector.shape_cast %6 : vector<1x128xf32> to vector<1x128xf32>
    %13 = vector.broadcast %12 : vector<1x128xf32> to vector<8x128xf32>
    %14 = vector.broadcast %cst : f32 to vector<8x128xf32>
    %15 = arith.select %11, %13, %14 : vector<8x128xi1>, vector<8x128xf32>
    %16 = tpu.iota {dimensions = array<i32: 0>} : vector<128x128xi32>
    %17 = vector.broadcast %5 : vector<1x128xi32> to vector<128x128xi32>
    %18 = arith.cmpi eq, %16, %17 : vector<128x128xi32>
    %19 = arith.extui %18 : vector<128x128xi1> to vector<128x128xi32>
    %20 = arith.sitofp %19 : vector<128x128xi32> to vector<128x128xf32>
    %c0_6 = arith.constant 0 : index
    %c0_7 = arith.constant 0 : index
    %21 = vector.load %arg5[%c0_6, %c0_7] : memref<8x128xf32, #tpu.memory_space<vmem>>, vector<8x128xf32>
    %cst_8 = arith.constant dense<0.000000e+00> : vector<8x128xf32>
    %22 = tpu.matmul %15, %20, %cst_8 {dimension_numbers = #tpu.dot_dimension_numbers<[1], [1], [0], [0], [0, 0, 1, 0], [], []>} : vector<8x128xf32>, vector<128x128xf32>, vector<8x128xf32> -> vector<8x128xf32>
    %23 = arith.addf %21, %22 : vector<8x128xf32>
    %c0_9 = arith.constant 0 : index
    %c0_10 = arith.constant 0 : index
    %24 = vector.load %arg5[%c0_9, %c0_10] : memref<8x128xf32, #tpu.memory_space<vmem>>, vector<8x128xf32>
    tpu.vector_store %arg5[%c0_9, %c0_10], %23 {strides = array<i32>} : memref<8x128xf32, #tpu.memory_space<vmem>>, vector<8x128xf32>,
    return
  }
  func.func @transform_0(%arg0: i32, %arg1: i32) -> (i32, i32) {
    %c0_i32 = arith.constant 0 : i32
    %c0_i32_0 = arith.constant 0 : i32
    return %c0_i32, %arg1 : i32, i32
  }
  func.func @transform_1(%arg0: i32, %arg1: i32) -> (i32, i32) {
    %c0_i32 = arith.constant 0 : i32
    %c0_i32_0 = arith.constant 0 : i32
    return %c0_i32, %arg1 : i32, i32
  }
  func.func @transform_2(%arg0: i32, %arg1: i32) -> (i32, i32) {
    %c0_i32 = arith.constant 0 : i32
    %c0_i32_0 = arith.constant 0 : i32
    return %c0_i32, %arg1 : i32, i32
  }
  func.func @transform_3(%arg0: i32, %arg1: i32) -> (i32, i32) {
    %c0_i32 = arith.constant 0 : i32
    %c0_i32_0 = arith.constant 0 : i32
    return %arg0, %c0_i32 : i32, i32
  }
}

</mosaic_0001>

<bundles_post_ra>
// kernel: tpu_custom_call.1
= control target key start
LH: loop header
LB: loop body
LE: loop exit
PB: predicated region body
PF: predicated region fallthrough
CT: control target
= control target key end

     0   :  { %8 = vsyncpa [#allocation3], 0  ;;  %s322_s0 = inlined_call_operand.hbm [shape: s32[1,128], index: 0, kind: input, shape index: {}]   ;;  %s323_s1 = inlined_call_operand.hbm [shape: s32[1,128], index: 1, kind: input, shape index: {}]   ;;  %s324_s2 = inlined_call_operand.vmem [shape: f32[1,128], index: 2, kind: input, shape index: {}]   ;;  %s325_s3 = inlined_call_operand.hbm [shape: f32[8,128], index: 3, kind: output, shape index: {}]  }
   0x1   :  { %9 = vsyncpa [#allocation6], 0 }
   0x2   :  { %10 = vsyncpa [#allocation4], 0  ;;  %s16_s14 = sshll.u32 %s322_s0, 4  ;;  %s286_s15 = smov [#allocation2]   ;;  %s17_s14 = int_to_ptr.hbm [resolvable:$true] %s16_s14 }
   0x3   :  { %s18_s16 = sshll.u32 %s286_s15, 4  ;;  %s27_s19 = sshll.u32 %s323_s1, 4  ;;  %s19_s16 = int_to_ptr.vmem [resolvable:$true] %s18_s16  ;;  %s28_s19 = int_to_ptr.hbm [resolvable:$true] %s27_s19 }
   0x4   :  { %21 = dma.hbm_to_vmem [thread:$0]  %s17_s14, 16, %s19_s16, [#allocation3]  }
   0x5   :  { %s287_s20 = smov [#allocation5]  }
   0x6   :  { %s29_s21 = sshll.u32 %s287_s20, 4  ;;  %s30_s21 = int_to_ptr.vmem [resolvable:$true] %s29_s21 }
   0x7   :  { %32 = dma.hbm_to_vmem [thread:$0]  %s28_s19, 16, %s30_s21, [#allocation6]  }
   0x8   :  { %280 = dma.done.wait [#allocation3], 16  }
   0x9   :  { %281 = vsyncadd [#allocation3], 4294967280 }
   0xa   :  { %282 = dma.done.wait [#allocation6], 16  }
   0xb   :  { %283 = vsyncadd [#allocation6], 4294967280  ;;  %v52_v0 = vlaneseq  ;;  %v205_v4 = vld [vmem:[#allocation5] ss:$0 sm:$0xff]  ;;  %v288_v5 = vmov 1.0   ;;  %s289_s22 = smov [#allocation7]  }
   0xc   :  { %v206_v19 = vld [vmem:[#allocation2] ss:$0 sm:$0xff]  ;;  %s154_s23 = sshll.u32 %s289_s22, 4  ;;  %s156_s26 = sshll.u32 %s325_s3, 4  ;;  %s155_s23 = int_to_ptr.vmem [resolvable:$true] %s154_s23  ;;  %s157_s26 = int_to_ptr.hbm [resolvable:$true] %s156_s26 }
   0xd   :  { %v53_v1 = vshrl.u32 %v52_v0, 7  ;;  %v207_v20 = vld [vmem:[%s324_s2] ss:$0 sm:$0xff] }
   0xf   :  { %v76_v2 = vadd.s32 120, %v53_v1  ;;  %v75_v3 = vadd.s32 112, %v53_v1  ;;  %v74_v6 = vadd.s32 104, %v53_v1  ;;  %v73_v7 = vadd.s32 96, %v53_v1 }
  0x10   :  { %v72_v8 = vadd.s32 88, %v53_v1  ;;  %v71_v9 = vadd.s32 80, %v53_v1  ;;  %v70_v10 = vadd.s32 72, %v53_v1  ;;  %v69_v11 = vadd.s32 64, %v53_v1 }
  0x11   :  { %vm93_vm0 = vcmp.eq.s32.totalorder %v76_v2, %v205_v4  ;;  %vm92_vm1 = vcmp.eq.s32.totalorder %v75_v3, %v205_v4  ;;  %vm91_vm2 = vcmp.eq.s32.totalorder %v74_v6, %v205_v4  ;;  %vm90_vm3 = vcmp.eq.s32.totalorder %v73_v7, %v205_v4 }
  0x12   :  { %183 = vmatpush.xpose.msk.msra.mxu0 %vm93_vm0, %v288_v5  ;;  %vm89_vm4 = vcmp.eq.s32.totalorder %v72_v8, %v205_v4  ;;  %vm88_vm5 = vcmp.eq.s32.totalorder %v71_v9, %v205_v4  ;;  %vm87_vm6 = vcmp.eq.s32.totalorder %v70_v10, %v205_v4  ;;  %vm86_vm7 = vcmp.eq.s32.totalorder %v69_v11, %v205_v4 }
  0x13   :  { %v68_v12 = vadd.s32 56, %v53_v1  ;;  %v67_v13 = vadd.s32 48, %v53_v1  ;;  %v66_v14 = vadd.s32 40, %v53_v1  ;;  %v65_v15 = vadd.s32 32, %v53_v1 }
  0x14   :  { %v64_v16 = vadd.s32 24, %v53_v1  ;;  %v63_v17 = vadd.s32 16, %v53_v1  ;;  %v62_v18 = vadd.s32 8, %v53_v1  ;;  %vm78_vm15 = vcmp.eq.s32.totalorder %v53_v1, %v205_v4 }
  0x15   :  { %vm85_vm8 = vcmp.eq.s32.totalorder %v68_v12, %v205_v4  ;;  %vm84_vm9 = vcmp.eq.s32.totalorder %v67_v13, %v205_v4  ;;  %vm83_vm10 = vcmp.eq.s32.totalorder %v66_v14, %v205_v4  ;;  %vm82_vm11 = vcmp.eq.s32.totalorder %v65_v15, %v205_v4 }
  0x16   :  { %184 = vmatpush.xpose.msk.msra.mxu0 %vm92_vm1, %v288_v5  ;;  %vm81_vm12 = vcmp.eq.s32.totalorder %v64_v16, %v205_v4  ;;  %vm80_vm13 = vcmp.eq.s32.totalorder %v63_v17, %v205_v4  ;;  %vm79_vm14 = vcmp.eq.s32.totalorder %v62_v18, %v205_v4  ;;  %vm57_vm0 = vcmp.eq.s32.totalorder %v53_v1, %v206_v19 }
  0x1a   :  { %185 = vmatpush.xpose.msk.msra.mxu0 %vm91_vm2, %v288_v5 }
  0x1e   :  { %186 = vmatpush.xpose.msk.msra.mxu0 %vm90_vm3, %v288_v5 }
  0x22   :  { %187 = vmatpush.xpose.msk.msra.mxu0 %vm89_vm4, %v288_v5 }
  0x26   :  { %188 = vmatpush.xpose.msk.msra.mxu0 %vm88_vm5, %v288_v5 }
  0x2a   :  { %189 = vmatpush.xpose.msk.msra.mxu0 %vm87_vm6, %v288_v5 }
  0x2e   :  { %190 = vmatpush.xpose.msk.msra.mxu0 %vm86_vm7, %v288_v5 }
  0x32   :  { %191 = vmatpush.xpose.msk.msra.mxu0 %vm85_vm8, %v288_v5 }
  0x36   :  { %192 = vmatpush.xpose.msk.msra.mxu0 %vm84_vm9, %v288_v5 }
  0x3a   :  { %193 = vmatpush.xpose.msk.msra.mxu0 %vm83_vm10, %v288_v5 }
  0x3e   :  { %194 = vmatpush.xpose.msk.msra.mxu0 %vm82_vm11, %v288_v5 }
  0x42   :  { %195 = vmatpush.xpose.msk.msra.mxu0 %vm81_vm12, %v288_v5 }
  0x46   :  { %196 = vmatpush.xpose.msk.msra.mxu0 %vm80_vm13, %v288_v5 }
  0x4a   :  { %197 = vmatpush.xpose.msk.msra.mxu0 %vm79_vm14, %v288_v5 }
  0x4e   :  { %198 = vmatpush.xpose.msk.msra.mxu0 %vm78_vm15, %v288_v5 }
  0x51   :  { %199 = vmatmul.msk.f32.vlgmr.msra.gmra.mxu0 %vm57_vm0, %v207_v20 }
  0xce   :  { %v144_v21 = vpop.f32.mrf.mxu0 }
  0xcf   :  { %148 = vst [vmem:[#allocation7] sm:$0xff] %v144_v21 }
  0xd0   :  { %159 = dma.vmem_to_hbm [thread:$0]  %s155_s23, 128, %s157_s26, [#allocation4]  }
  0xd1   :  { %284 = dma.done.wait [#allocation4], 128  }
  0xd2   :  { %285 = vsyncadd [#allocation4], 4294967168 }
  0xd3   :  { %164 = vsyncpa [#allocation3], 1 }
  0xd4   :  { %165 = vsyncpa [#allocation6], 1 }
  0xd5   :  { %166 = vsyncpa [#allocation4], 1 }

</bundles_post_ra>
